<compile_context>
chip_gen: v7x
topology: tpu7x:2x2x1
jax: 0.10.0
libtpu: 0.0.40
codegen_flags: <defaults>
</compile_context>

<pallas_src>
import jax
import jax.numpy as jnp
from jax import lax
from jax.experimental import pallas as pl
from jax.experimental.pallas import tpu as pltpu


def _span_attn_kernel(x_ref, logits_ref, starts_ref, ends_ref, out_ref):
    # x_ref:      (1, T, D)        sequence embeddings (resident across the span-tile axis)
    # logits_ref: (1, 1, T)  f32   precomputed global-attention token logits
    # starts_ref: (1, TN, 1) i32   inclusive span starts for this tile
    # ends_ref:   (1, TN, 1) i32   inclusive span ends for this tile
    # out_ref:    (1, TN, D)       attention-pooled span embeddings
    x = x_ref[0]                  # (T, D)
    logits = logits_ref[0]        # (1, T) f32
    starts = starts_ref[0]        # (TN, 1)
    ends = ends_ref[0]            # (TN, 1)
    tn = starts.shape[0]
    t = x.shape[0]

    # Per-span token mask (inclusive end, AllenNLP batched_span_select convention).
    tok = lax.broadcasted_iota(jnp.int32, (tn, t), 1)
    mask = (tok >= starts) & (tok <= ends)                           # (TN, T) bool

    # Numerically-stable masked softmax numerator.  For valid spans exp(-1e30 - m) underflows
    # to exactly 0, so no extra `* mask_f32` multiply / temporary is needed.
    neg = jnp.float32(-1e30)
    masked = jnp.where(mask, jnp.broadcast_to(logits, (tn, t)), neg)  # (TN, T)
    m = jnp.max(masked, axis=-1, keepdims=True)                       # (TN, 1)
    p = jnp.exp(masked - m)                                           # (TN, T)
    denom = jnp.sum(p, axis=-1, keepdims=True)                        # (TN, 1)

    # MXU matmul with *unnormalized* weights; normalization deferred to a cheap (TN, D) scale.
    # Casting p to the input dtype enables the bf16 MXU path when x is bf16 (f32 accumulate).
    acc = jnp.dot(p.astype(x.dtype), x, preferred_element_type=jnp.float32)   # (TN, D)

    # Fully-masked (padded / start>end) spans would otherwise get uniform weights; zero them.
    valid = (ends >= starts).astype(jnp.float32)                      # (TN, 1)
    scale = valid * pl.reciprocal(denom)   # exact; approx=True is an EUP option in production
    out_ref[0] = (acc * scale).astype(out_ref.dtype)


def bucketed_span_extractor(sequence_tensor, span_indices, w, b, *, span_tile=512):
    """Pallas forward of BucketedSpanExtractor(SelfAttentiveSpanExtractor)."""
    B, T, D = sequence_tensor.shape
    _, N, _ = span_indices.shape
    itemsize = jnp.dtype(sequence_tensor.dtype).itemsize

    # Cached global attention (_CachedModule): token logits computed once per batch row in
    # plain XLA; the kernel never runs the thin (1, D) x (D, T) matvec.
    logits = (
        jnp.einsum(
            "btd,d->bt",
            sequence_tensor.astype(jnp.float32),
            w.reshape(-1).astype(jnp.float32),
        )
        + b.reshape(()).astype(jnp.float32)
    ).reshape(B, 1, T)

    # Span-tile size: multiple of the sublane tile (16 for bf16 packing, 8 for f32), capped so
    # the (TN, T) softmax temporaries stay well inside v7x's 64 MiB VMEM.
    sub = 16 if itemsize == 2 else 8
    tn = min(span_tile, pl.cdiv(N, sub) * sub)
    n_pad = pl.cdiv(N, tn) * tn

    starts = span_indices[..., 0:1].astype(jnp.int32)                 # (B, N, 1)
    ends = span_indices[..., 1:2].astype(jnp.int32)                   # (B, N, 1)
    if n_pad != N:
        pad = ((0, 0), (0, n_pad - N), (0, 0))
        starts = jnp.pad(starts, pad, constant_values=0)
        ends = jnp.pad(ends, pad, constant_values=-1)                 # start>end => zeroed

    # VMEM budget estimate: resident x + logits + double-buffered span/out blocks + softmax
    # temporaries.  Only raise the scoped limit when needed; never above v7x's 64 MiB physical.
    est = (2 * T * D * itemsize + 2 * T * 4 + 4 * tn * 4
           + 2 * tn * D * itemsize + 5 * tn * T * 4)
    vmem_limit = int(est * 1.5)
    vmem_limit = None if vmem_limit <= (32 << 20) else min(vmem_limit, 64 << 20)

    out = pl.pallas_call(
        _span_attn_kernel,
        out_shape=jax.ShapeDtypeStruct((B, n_pad, D), sequence_tensor.dtype),
        grid=(B, n_pad // tn),
        in_specs=[
            pl.BlockSpec((1, T, D), lambda i, j: (i, 0, 0)),   # resident across span tiles
            pl.BlockSpec((1, 1, T), lambda i, j: (i, 0, 0)),   # resident across span tiles
            pl.BlockSpec((1, tn, 1), lambda i, j: (i, j, 0)),
            pl.BlockSpec((1, tn, 1), lambda i, j: (i, j, 0)),
        ],
        out_specs=pl.BlockSpec((1, tn, D), lambda i, j: (i, j, 0)),
        compiler_params=pltpu.CompilerParams(
            dimension_semantics=("parallel", "parallel"),
            vmem_limit_bytes=vmem_limit,
        ),
    )(sequence_tensor, logits, starts, ends)

    return out[:, :N, :]


def _reference(sequence_tensor, span_indices, w, b):
    """Plain-JAX reference (mirrors SelfAttentiveSpanExtractor)."""
    B, T, D = sequence_tensor.shape
    logits = jnp.einsum("btd,d->bt", sequence_tensor, w.reshape(-1)) + b.reshape(())
    starts = span_indices[..., 0]
    ends = span_indices[..., 1]
    tok = jnp.arange(T)[None, None, :]
    mask = (tok >= starts[..., None]) & (tok <= ends[..., None])      # (B, N, T)
    masked = jnp.where(mask, logits[:, None, :], -1e30)
    wts = jax.nn.softmax(masked, axis=-1) * mask
    wts = wts / (wts.sum(-1, keepdims=True) + 1e-13)
    return jnp.einsum("bnt,btd->bnd", wts, sequence_tensor)


if __name__ == "__main__":
    B, T, D, N = 2, 16, 32, 8

    key = jax.random.PRNGKey(0)
    kx, kw, kb, ks = jax.random.split(key, 4)

    x = jax.random.normal(kx, (B, T, D), jnp.float32)
    # Deterministic "parameters" of nn.Linear(D, 1) (the module's _global_attention).
    w = jax.random.normal(kw, (1, D), jnp.float32) * 0.1
    b = jax.random.normal(kb, (1,), jnp.float32) * 0.1

    # Spans: inclusive [start, end], sorted by width (module assumption).
    starts = jax.random.randint(ks, (B, N), 0, T)
    widths = jnp.sort(jnp.arange(N) % 5)
    ends = jnp.minimum(starts + widths[None, :], T - 1)
    span_indices = jnp.stack([starts, ends], axis=-1).astype(jnp.int32)   # (B, N, 2)

    out = jax.block_until_ready(bucketed_span_extractor(x, span_indices, w, b))
    ref = _reference(x, span_indices, w, b)
    assert out.shape == (B, N, D)
    assert jnp.allclose(out, ref, atol=1e-5, rtol=1e-5), float(jnp.max(jnp.abs(out - ref)))

    # Second shape: N not a multiple of the sublane tile -> exercises span padding + the
    # zeroing of invalid (start > end) padded spans.
    N2 = 10
    starts2 = jax.random.randint(jax.random.PRNGKey(1), (B, N2), 0, T)
    widths2 = jnp.sort(jnp.arange(N2) % 4)
    ends2 = jnp.minimum(starts2 + widths2[None, :], T - 1)
    spans2 = jnp.stack([starts2, ends2], axis=-1).astype(jnp.int32)       # (B, N2, 2)
    out2 = jax.block_until_ready(bucketed_span_extractor(x, spans2, w, b))
    ref2 = _reference(x, spans2, w, b)
    assert out2.shape == (B, N2, D)
    assert jnp.allclose(out2, ref2, atol=1e-5, rtol=1e-5), float(jnp.max(jnp.abs(out2 - ref2)))

    print("KERNEL_OK")
</pallas_src>

<mosaic_0001>
module attributes {stable_mosaic.version = 11 : i64} {
  func.func @_span_attn_kernel(%arg0: i32, %arg1: i32, %arg2: memref<1x16x32xf32, #tpu.memory_space<vmem>>, %arg3: memref<1x1x16xf32, #tpu.memory_space<vmem>>, %arg4: memref<1x8x1xi32, #tpu.memory_space<vmem>>, %arg5: memref<1x8x1xi32, #tpu.memory_space<vmem>>, %arg6: memref<1x8x32xf32, #tpu.memory_space<vmem>>) attributes {dimension_semantics = [#tpu.dimension_semantics<parallel>, #tpu.dimension_semantics<parallel>], iteration_bounds = array<i64: 2, 1>, scalar_prefetch = 0 : i64, scratch_operands = 0 : i64, tpu.core_type = #tpu.core_type<tc>, window_params = [{transform_indices = @transform_0, window_bounds = array<i64: 1, 16, 32>}, {transform_indices = @transform_1, window_bounds = array<i64: 1, 1, 16>}, {transform_indices = @transform_2, window_bounds = array<i64: 1, 8, 1>}, {transform_indices = @transform_3, window_bounds = array<i64: 1, 8, 1>}, {transform_indices = @transform_4, window_bounds = array<i64: 1, 8, 32>}]} {
    %c0 = arith.constant 0 : index
    %c0_0 = arith.constant 0 : index
    %c0_1 = arith.constant 0 : index
    %0 = vector.load %arg2[%c0, %c0_0, %c0_1] : memref<1x16x32xf32, #tpu.memory_space<vmem>>, vector<1x16x32xf32>
    %1 = vector.shape_cast %0 : vector<1x16x32xf32> to vector<16x32xf32>
    %c0_2 = arith.constant 0 : index
    %c0_3 = arith.constant 0 : index
    %c0_4 = arith.constant 0 : index
    %2 = vector.load %arg3[%c0_2, %c0_3, %c0_4] : memref<1x1x16xf32, #tpu.memory_space<vmem>>, vector<1x1x16xf32>
    %3 = vector.shape_cast %2 : vector<1x1x16xf32> to vector<1x16xf32>
    %c0_5 = arith.constant 0 : index
    %c0_6 = arith.constant 0 : index
    %c0_7 = arith.constant 0 : index
    %4 = vector.load %arg4[%c0_5, %c0_6, %c0_7] : memref<1x8x1xi32, #tpu.memory_space<vmem>>, vector<1x8x1xi32>
    %5 = vector.shape_cast %4 : vector<1x8x1xi32> to vector<8x1xi32>
    %c0_8 = arith.constant 0 : index
    %c0_9 = arith.constant 0 : index
    %c0_10 = arith.constant 0 : index
    %6 = vector.load %arg5[%c0_8, %c0_9, %c0_10] : memref<1x8x1xi32, #tpu.memory_space<vmem>>, vector<1x8x1xi32>
    %7 = vector.shape_cast %6 : vector<1x8x1xi32> to vector<8x1xi32>
    %8 = tpu.iota {dimensions = array<i32: 1>} : vector<8x16xi32>
    %9 = vector.broadcast %5 : vector<8x1xi32> to vector<8x16xi32>
    %10 = arith.cmpi sge, %8, %9 : vector<8x16xi32>
    %11 = vector.broadcast %7 : vector<8x1xi32> to vector<8x16xi32>
    %12 = arith.cmpi sle, %8, %11 : vector<8x16xi32>
    %13 = arith.andi %10, %12 : vector<8x16xi1>
    %14 = vector.shape_cast %3 : vector<1x16xf32> to vector<1x16xf32>
    %15 = vector.broadcast %14 : vector<1x16xf32> to vector<8x16xf32>
    %cst = arith.constant -1.000000e+30 : f32
    %16 = vector.broadcast %cst : f32 to vector<8x16xf32>
    %17 = arith.select %13, %15, %16 : vector<8x16xi1>, vector<8x16xf32>
    %cst_11 = arith.constant dense<0xFF800000> : vector<8xf32>
    %18 = vector.multi_reduction <maximumf>, %17, %cst_11 [1] : vector<8x16xf32> to vector<8xf32>
    %19 = vector.shape_cast %18 : vector<8xf32> to vector<8x1xf32>
    %20 = vector.broadcast %19 : vector<8x1xf32> to vector<8x16xf32>
    %21 = arith.subf %17, %20 : vector<8x16xf32>
    %22 = math.exp %21 : vector<8x16xf32>
    %cst_12 = arith.constant dense<0.000000e+00> : vector<8xf32>
    %23 = vector.multi_reduction <add>, %22, %cst_12 [1] : vector<8x16xf32> to vector<8xf32>
    %24 = vector.shape_cast %23 : vector<8xf32> to vector<8x1xf32>
    %cst_13 = arith.constant dense<0.000000e+00> : vector<8x32xf32>
    %25 = tpu.matmul %22, %1, %cst_13 {dimension_numbers = #tpu.dot_dimension_numbers<[1], [0], [0], [1], [0, 0, 1, 1], [], []>} : vector<8x16xf32>, vector<16x32xf32>, vector<8x32xf32> -> vector<8x32xf32>
    %26 = arith.cmpi sge, %7, %5 : vector<8x1xi32>
    %27 = arith.extui %26 : vector<8x1xi1> to vector<8x1xi32>
    %28 = arith.sitofp %27 : vector<8x1xi32> to vector<8x1xf32>
    %29 = tpu.reciprocal %24 : vector<8x1xf32> -> vector<8x1xf32>
    %30 = arith.mulf %28, %29 : vector<8x1xf32>
    %31 = vector.broadcast %30 : vector<8x1xf32> to vector<8x32xf32>
    %32 = arith.mulf %25, %31 : vector<8x32xf32>
    %c0_14 = arith.constant 0 : index
    %c0_15 = arith.constant 0 : index
    %c0_16 = arith.constant 0 : index
    %33 = vector.load %arg6[%c0_14, %c0_15, %c0_16] : memref<1x8x32xf32, #tpu.memory_space<vmem>>, vector<1x8x32xf32>
    %34 = vector.shape_cast %33 : vector<1x8x32xf32> to vector<8x32xf32>
    %35 = vector.shape_cast %32 : vector<8x32xf32> to vector<1x8x32xf32>
    tpu.vector_store %arg6[%c0_14, %c0_15, %c0_16], %35 {strides = array<i32>} : memref<1x8x32xf32, #tpu.memory_space<vmem>>, vector<1x8x32xf32>,
    return
  }
  func.func @transform_0(%arg0: i32, %arg1: i32) -> (i32, i32, i32) {
    %c0_i32 = arith.constant 0 : i32
    %c0_i32_0 = arith.constant 0 : i32
    %c0_i32_1 = arith.constant 0 : i32
    return %arg0, %c0_i32, %c0_i32_0 : i32, i32, i32
  }
  func.func @transform_1(%arg0: i32, %arg1: i32) -> (i32, i32, i32) {
    %c0_i32 = arith.constant 0 : i32
    %c0_i32_0 = arith.constant 0 : i32
    %c0_i32_1 = arith.constant 0 : i32
    return %arg0, %c0_i32, %c0_i32_0 : i32, i32, i32
  }
  func.func @transform_2(%arg0: i32, %arg1: i32) -> (i32, i32, i32) {
    %c0_i32 = arith.constant 0 : i32
    %c0_i32_0 = arith.constant 0 : i32
    return %arg0, %arg1, %c0_i32 : i32, i32, i32
  }
  func.func @transform_3(%arg0: i32, %arg1: i32) -> (i32, i32, i32) {
    %c0_i32 = arith.constant 0 : i32
    %c0_i32_0 = arith.constant 0 : i32
    return %arg0, %arg1, %c0_i32 : i32, i32, i32
  }
  func.func @transform_4(%arg0: i32, %arg1: i32) -> (i32, i32, i32) {
    %c0_i32 = arith.constant 0 : i32
    %c0_i32_0 = arith.constant 0 : i32
    return %arg0, %arg1, %c0_i32 : i32, i32, i32
  }
}

</mosaic_0001>

<bundles_post_ra>
// kernel: tpu_custom_call.1
= control target key start
LH: loop header
LB: loop body
LE: loop exit
PB: predicated region body
PF: predicated region fallthrough
CT: control target
= control target key end

     0   :  { %9 = vsyncpa [#allocation3], 0  ;;  %s851_s0 = inlined_call_operand.vmem [shape: f32[2,16,32], index: 0, kind: input, shape index: {}]   ;;  %s852_s1 = inlined_call_operand.vmem [shape: f32[2,1,16], index: 1, kind: input, shape index: {}]   ;;  %s853_s2 = inlined_call_operand.vmem [shape: s32[2,8,1], index: 2, kind: input, shape index: {}]   ;;  %s854_s3 = inlined_call_operand.vmem [shape: s32[2,8,1], index: 3, kind: input, shape index: {}]   ;;  %s855_s4 = inlined_call_operand.hbm [shape: f32[2,8,32], index: 4, kind: output, shape index: {}]  }
   0x1   :  { %11 = vsyncpa [#allocation3 + $0x1], 0  ;;  %s726_s15 = smov 0   ;;  %s728_s16 = smov 0  }
   0x2   :  { %s730_s17 = smov 0   ;;  %s732_s18 = smov 0  }
   0x3   :  { %s734_s19 = smov 0   ;;  %s736_s20 = smov 0  }
   0x4 LB: > { %s521_s21 = sadd.s32 4294967295, %s694_s20   ;;  %s522_s22 = sadd.s32 4294967294, %s694_s20   ;;  %s694_s20 = sphi %s736_s20, %s17_s20   ;;  %s690_s19 = sphi %s734_s19, %s862_s19   ;;  %s686_s18 = sphi %s732_s18, %s861_s18   ;;  %s682_s17 = sphi %s730_s17, %s860_s17   ;;  %s678_s16 = sphi %s728_s16, %s859_s16   ;;  %s674_s15 = sphi %s726_s15, %s858_s15  }
   0x5   : > { %s29_s23 = sadd.s32 1, %s690_s19  ;;  %s146_s24 = sadd.s32 1, %s682_s17 }
   0x6   : > { %p31_p0 = scmp.ge.s32.totalorder %s29_s23, 2  ;;  %p156_p1 = scmp.ne.s32.totalorder %s682_s17, %s678_s16 }
   0x7   : > { %p157_p2 = scmp.eq.s32.totalorder %s521_s21, 1  ;;  %p162_p3 = scmp.ne.s32.totalorder %s678_s16, %s674_s15 }
   0x8   : > { %s864_s23 = smov (%p31_p0, %s29_s23), 0  ;;  %p163_p5 = scmp.eq.s32.totalorder %s522_s22, 1 }
   0x9   : > { %p766_p4 = por %p157_p2, %p156_p1  ;;  %s141_s26 = ssub.s32 %s690_s19, %s864_s23 }
   0xa   : > { %p525_p6 = scmp.ge.s32.totalorder %s694_s20, 1  ;;  %p144_p7 = scmp.eq.s32.totalorder %s141_s26, 0 }
   0xb   : > { %p773_p8 = por %p163_p5, %p162_p3  ;;  %p215_p9 = scmp.lt.s32.totalorder %s694_s20, 3 }
   0xc   : > { %s779_s28 = scalar_select %p144_p7, %s682_s17, %s146_s24  }
   0xd   : > { %p216_p10 = pnand %p525_p6, %p215_p9 }
   0xe   : > { %p258_p11 = scmp.lt.s32.totalorder (!%p216_p10), %s686_s18, 1  ;;  %v696_v0 = vmov (!%p216_p10), 0   ;;  %v285_v3 = vlaneseq (!%p216_p10)  ;;  %vm303_vm3 = vcmask (!%p216_p10), 130048   ;;  %v697_v10 = vmov (!%p216_p10), 0.0|0.0   ;;  %s255_s26 = sand.u32 (!%p216_p10), 1, %s678_s16  }
   0xf   : > { %219 = sbr.rel (%p216_p10) target bundleno = 620 (0x26c), region = 36  ;;  %611 = vset.pattern.permute.xlu0 (!%p216_p10), %v696_v0  ;;  %549 = vmatprep.subr.bf16.mxu0 (!%p216_p10), %v697_v10  ;;  %vm698_vm5 = vmmov (!%p216_p10), 0   ;;  %v699_v11 = vmov (!%p216_p10), 0.0   ;;  %vm397_vm6 = vcmask (!%p216_p10), 261120  }
  0x10   : > { %v286_v5 = vand.u32 (!%p216_p10), 127, %v285_v3  ;;  %546 = vmatprep.mubr.msk.f32.mxu0 (!%p216_p10), %vm698_vm5, %v699_v11 }
  0x16   : > { %s259_s29 = scalar_select %p258_p11, %s686_s18, 1 }
  0x18   : > { %s529_s30 = sshll.u32 %s259_s29, 3  ;;  %s265_s13 = scalar_lea.vmem %s852_s1, %s259_s29 }
  0x19   : > { %s272_s7 = scalar_lea.vmem %s853_s2, %s529_s30  ;;  %s279_s10 = scalar_lea.vmem %s854_s3, %s529_s30  ;;  %v531_v7 = vld [vmem:[%s265_s13] ss:$0 sm:$0xff] }
  0x1a   : > { %v283_v1 = vld [vmem:[%s272_s7] sm:$0xff]  ;;  %s538_s14 = sshll.u32 %s259_s29, 4  ;;  %s526_s29 = sshll.u32 %s255_s26, 3 }
  0x1b   : > { %v284_v2 = vld [vmem:[%s279_s10] sm:$0xff]  ;;  %288 = vperm.xlu0 %611, %v283_v1   ;;  %s262_s24 = scalar_lea.vmem %s851_s0, %s538_s14  ;;  %s535_s30 = sshll.u32 %s686_s18, 7 }
  0x1c   : > { %vm386_vm0 = vcmp.ge.s32.totalorder %v284_v2, %v283_v1  ;;  %v280_v13 = vld [vmem:[%s262_s24] sm:$0xff]  ;;  %v281_v14 = vld [vmem:[%s262_s24 + $0x8] sm:$0xff]  ;;  %s257_s5 = scalar_lea.vmem [#allocation2], %s526_s29  ;;  %s804_s9 = scalar_lea.hbm %s855_s4, %s535_s30 }
  0x1d   : > { %v533_v12 = vsel %vm386_vm0, 1.0, %v699_v11  ;;  %v550_v15 = vpack.c.bf16 %v281_v14, %v280_v13  ;;  %s414_s6 = sshll.u32 %s257_s5, 4  ;;  %s400_s10 = scalar_lea.sflag [#allocation3], %s255_s26  ;;  %s806_s6 = int_to_ptr.vmem [resolvable:$true] %s414_s6 }
  0x1e   : > { %s616_s11 = scalar_lea.vmem %s806_s6, 128  ;;  %s700_s18 = smov [#allocation2]  }
  0x1f   : > { %292 = vperm.xlu0 %611, %v284_v2   ;;  %551 = vmatpush3.bf16.msra.mxu0 %v550_v15  ;;  %p617_p12 = scmp.ne.s32.totalorder %s806_s6, %s616_s11  ;;  %s620_s12 = sshll.u32 %s700_s18, 4  ;;  %s621_s12 = int_to_ptr.vmem [resolvable:$false] %s620_s12 }
  0x20   : > { %s622_s13 = scalar_lea.vmem %s621_s12, 256  ;;  %p623_p1 = scmp.lt.s32.totalorder %s806_s6, %s621_s12 }
  0x21   : > { %p618_p13 = pnand %p617_p12, %p766_p4  ;;  %p624_p2 = scmp.lt.s32.totalorder %s622_s13, %s616_s11 }
  0x23   : > { %p619_p0 = pneg %p618_p13  ;;  %p625_p3 = por %p624_p2, %p623_p1 }
  0x25   : > { %p626_p5 = pnand %p625_p3, %p619_p0 }
  0x9a   : > { %v289_v4 = vpop.permute.xlu0 %288 }
  0x9b   : > { %vm290_vm1 = vcmp.ge.s32.totalorder %v286_v5, %v289_v4 }
  0x9e   : > { %v293_v6 = vpop.permute.xlu0 %292 }
  0x9f   : > { %vm294_vm2 = vcmp.le.s32.totalorder %v286_v5, %v293_v6 }
  0xa0   : > { %vm295_vm4 = vmand %vm290_vm1, %vm294_vm2 }
  0xa1   : > { %v302_v8 = vsel %vm295_vm4, %v531_v7, -1e+30 }
  0xa2   : > { %v304_v9 = vsel %vm303_vm3, %v302_v8, -inf }
  0xa3   : > { %305 = vmax.xlane.f32.xlu1 %v304_v9 }
 0x130   : > { %v306_v16 = vpop.xlane.xlu1 %305 }
 0x131   : > { %v307_v17 = vsub.f32 %v302_v8, %v306_v16 }
 0x133   : > { %v308_v18 = vmul.f32 1.442695, %v307_v17 }
 0x135   : > { %612 = vpow2.f32 %v308_v18 }
 0x13f   : > { %v613_v19 = vpop.eup %612 }
 0x140   : > { %547 = vmatmul.mubr.msk.f32.vlgmr.msra.gmra.mrb[0].mxu0 %vm303_vm3, %v613_v19  ;;  %v310_v20 = vsel %vm303_vm3, %v613_v19, 0.0 }
 0x141   : > { %311 = vadd.xlane.f32.xlu1 %v310_v20 }
 0x1ce   : > { %v312_v21 = vpop.xlane.xlu1 %311 }
 0x1cf   : > { %614 = vrcp.f32 %v312_v21 }
 0x1d9   : > { %v615_v22 = vpop.eup %614 }
 0x1da   : > { %v390_v23 = vmul.f32 %v615_v22, %v533_v12 }
 0x1dc   : > { %393 = vperm.xlu0 %611, %v390_v23  }
 0x213   : > { %v382_v24 = vpop.f32.mrb[0].mxu0 }
 0x214   : > { %v548_v25 = vpop.f32.mrb[1].mxu0 }
 0x25b   : > { %v394_v26 = vpop.permute.xlu0 %393 }
 0x25c   : > { %v396_v27 = vmul.f32 %v394_v26, %v382_v24 }
 0x25e   : > { %398 = vst.msk [vmem:[%s257_s5] sm:$0xff] %vm397_vm6, %v396_v27 }
 0x25f   : > { %629 = shalt.err (!%p626_p5)
}
 0x260   : > { %s630_s14 = scalar_lea.hbm %s804_s9, 128  ;;  %s634_s24 = scalar_lea.hbm %s855_s4, 256 }
 0x261   : > { %p631_p6 = scmp.ne.s32.totalorder %s804_s9, %s630_s14  ;;  %p635_p10 = scmp.lt.u32.totalorder %s804_s9, %s855_s4 }
 0x262   : > { %p636_p11 = scmp.lt.u32.totalorder %s634_s24, %s630_s14  ;;  %p638_p13 = scmp.lt.u32.totalorder %s630_s14, %s804_s9 }
 0x263   : > { %p632_p7 = pnand %p631_p6, %p766_p4 }
 0x264   : > { %p637_p12 = por %p636_p11, %p635_p10 }
 0x265   : > { %p633_p9 = pneg %p632_p7 }
 0x266   : > { %p639_p0 = por %p638_p13, %p637_p12 }
 0x268   : > { %p640_p1 = pnand %p639_p0, %p633_p9 }
 0x26a   : > { %643 = shalt.err (!%p640_p1)
}
 0x26b   : > { %552 = dma.vmem_to_hbm [thread:$0]  (%p766_p4), %s806_s6, 128, %s804_s9, %s400_s10  }
 0x26c PF: > { %p558_p2 = scmp.ge.s32.totalorder %s694_s20, 2  ;;  %s426_s30 = sand.u32 1, %s674_s15  }
 0x26d   : > { %s427_s5 = scalar_lea.sflag [#allocation3], %s426_s30 }
 0x26e   : > { %p555_p3 = pnand %p558_p2, %p773_p8 }
 0x270   : > { %669 = dma.done.wait (!%p555_p3), %s427_s5, 128  }
 0x271   : > { %671 = vsyncadd (!%p555_p3), %s427_s5, 4294967168  ;;  %s17_s20 = sadd.s32 1, %s694_s20   ;;  %s858_s15 = smov %s678_s16 }
 0x272   : > { %p14_p5 = scmp.ge.s32.totalorder %s17_s20, 4   ;;  %s859_s16 = smov %s682_s17 }
 0x273   : > { %s860_s17 = smov %s779_s28  ;;  %s861_s18 = smov %s690_s19 }
 0x274   : > { %s862_s19 = smov %s864_s23  ;;  %16 = sbr.rel (!%p14_p5) target bundleno = 4 (0x4), region = 80 }
 0x27b   :  { %432 = vsyncpa [#allocation3], 1 }
 0x27c   :  { %434 = vsyncpa [#allocation3 + $0x1], 1 }

</bundles_post_ra>
